<compile_context>
chip_gen: v7x
topology: tpu7x:2x2x1
jax: 0.10.0
libtpu: 0.0.40
codegen_flags: <defaults>
</compile_context>

<pallas_src>
import functools

import jax
import jax.numpy as jnp
from jax.experimental import pallas as pl
from jax.experimental.pallas import tpu as pltpu


def _round_up(x, m):
    return ((x + m - 1) // m) * m


# ----------------------------------------------------------------------------
# Pallas kernels
# ----------------------------------------------------------------------------
def stem_kernel(p_ref, w_ref, b_ref, o_ref):
    # TODO(synk): the DLA-up backbone has no clean Pallas equivalent; this is a
    # deterministic patchify + matmul + ReLU stand-in that produces the same
    # (N, H/d, W/d, C) feature-map interface.
    y = jnp.dot(p_ref[...], w_ref[...], preferred_element_type=jnp.float32)
    o_ref[...] = jnp.maximum(y + b_ref[...], 0.0).astype(o_ref.dtype)


def heads_kernel(x_ref, w1_ref, b1_ref, w2_ref, b2_ref, w3_ref, b3_ref,
                 w4_ref, b4_ref, out_ref, col_ref, y1_ref, y2_ref, *, C):
    """dim / rot / dep heads on pooled ROI features (im2col K-stacked convs).

    x_ref  : (49, Rb, C)     bf16  pooled 7x7 ROI features
    w1_ref : (9C, 3C)        bf16  layer-1 taps K-stacked, 3 heads fused
    b1_ref : (1, 3C)         f32   folded BN shift (fused heads)
    w2_ref : (3, 9C, C)      bf16  per-head layer-2 K-stacked ; b2_ref (3,1,C)
    w3_ref : (3, 9C, C)      bf16  per-head layer-3 K-stacked ; b3_ref (3,1,C)
    w4_ref : (3C, 128)       bf16  block-diag final 1x1 (cols 0:3 dim, 3:11 rot,
                                   11:12 dep-logit, rest zero padding)
    b4_ref : (1, 128)        f32
    out_ref: (Rb, 128)       f32   lane-dense fused head output
    col_ref: (2, 5Rb, 9C)    bf16  double-buffered im2col staging scratch
    y1_ref : (25, Rb, 3C)    bf16  layer-1 output, all heads
    y2_ref : (3, Rb, 9C)     bf16  per-head layer-2 output, stored directly in
                                   layer-3 im2col layout (no WAR across heads)
    """
    Rb = x_ref.shape[1]
    f32 = jnp.float32
    bf16 = jnp.bfloat16

    # ---- layer 1: 7x7 -> 5x5, three heads fused on output channels ----------
    # one (5*Rb, 9C) x (9C, 3C) dot per output row; taps staged into col_ref.
    for oi in range(5):
        slot = oi % 2
        for ki in range(3):
            for kj in range(3):
                s = (oi + ki) * 7 + kj
                t = ki * 3 + kj
                col_ref[slot, 0:5 * Rb, t * C:(t + 1) * C] = (
                    x_ref[s:s + 5].reshape(5 * Rb, C))
        y = jnp.dot(col_ref[slot, 0:5 * Rb, :], w1_ref[...],
                    preferred_element_type=f32)
        y = jnp.maximum(y + b1_ref[...], 0.0)
        y1_ref[oi * 5:(oi + 1) * 5] = y.reshape(5, Rb, 3 * C).astype(bf16)

    # ---- layer 2: 5x5 -> 3x3, per head; output written in L3-im2col layout --
    for h in range(3):                                       # 0:dim 1:rot 2:dep
        for oi in range(3):
            slot = (h * 3 + oi) % 2
            for ki in range(3):
                for kj in range(3):
                    s = (oi + ki) * 5 + kj
                    t = ki * 3 + kj
                    col_ref[slot, 0:3 * Rb, t * C:(t + 1) * C] = (
                        y1_ref[s:s + 3, :, h * C:(h + 1) * C].reshape(3 * Rb, C))
            y = jnp.dot(col_ref[slot, 0:3 * Rb, :], w2_ref[h],
                        preferred_element_type=f32)
            y = jnp.maximum(y + b2_ref[h], 0.0).astype(bf16).reshape(3, Rb, C)
            for j in range(3):
                p = oi * 3 + j
                y2_ref[h, :, p * C:(p + 1) * C] = y[j]

    # ---- layer 3: 3x3 -> 1x1 per head (already im2col) + fused final 1x1 ----
    y3 = []
    for h in range(3):
        y = jnp.dot(y2_ref[h], w3_ref[h], preferred_element_type=f32)
        y3.append(jnp.maximum(y + b3_ref[h], 0.0).astype(bf16))
    ycat = jnp.concatenate(y3, axis=-1)                      # (Rb, 3C) bf16
    out_ref[...] = (jnp.dot(ycat, w4_ref[...], preferred_element_type=f32)
                    + b4_ref[...])


# ----------------------------------------------------------------------------
# Wrappers around pallas_call
# ----------------------------------------------------------------------------
def stem(image, w, b, d):
    N, cin, H, W = image.shape
    Hf, Wf = H // d, W // d
    x = jnp.transpose(image, (0, 2, 3, 1))                   # NHWC
    x = x.reshape(N, Hf, d, Wf, d, cin)
    x = jnp.transpose(x, (0, 1, 3, 2, 4, 5)).reshape(N * Hf * Wf, d * d * cin)
    M, Kd = x.shape
    C = w.shape[1]
    K_pad = _round_up(Kd, 128)                               # 192 -> 256
    TM = min(1024, _round_up(M, 8))                          # big mem-bound tile
    M_pad = _round_up(M, TM)
    x = jnp.pad(x, ((0, M_pad - M), (0, K_pad - Kd))).astype(jnp.bfloat16)
    wq = jnp.pad(w, ((0, K_pad - Kd), (0, 0))).astype(jnp.bfloat16)
    out = pl.pallas_call(
        stem_kernel,
        out_shape=jax.ShapeDtypeStruct((M_pad, C), jnp.bfloat16),
        grid=(M_pad // TM,),
        in_specs=[pl.BlockSpec((TM, K_pad), lambda i: (i, 0)),
                  pl.BlockSpec((K_pad, C), lambda i: (0, 0)),
                  pl.BlockSpec((1, C), lambda i: (0, 0))],
        out_specs=pl.BlockSpec((TM, C), lambda i: (i, 0)),
        compiler_params=pltpu.CompilerParams(
            dimension_semantics=("parallel",)),
    )(x, wq, b)
    return out[:M].reshape(N, Hf, Wf, C)                     # bf16 feature map


def run_heads(pooled, params, C):
    """pooled: (R, 7, 7, C) -> (dim (R,3), rot_raw (R,8), dep_logit (R,))."""
    R = pooled.shape[0]
    # ROI tile: multiple of 32 sublanes (bf16-legal); for moderate R make the
    # grid >= 2 programs so both v7x TensorCores get work; cap at 128.
    if R <= 32:
        Rb = 32
    elif R <= 256:
        Rb = _round_up((R + 1) // 2, 32)
    else:
        Rb = 128
    R_pad = _round_up(R, Rb)

    x = jnp.transpose(pooled, (1, 2, 0, 3)).reshape(49, R, C)
    x = jnp.pad(x, ((0, 0), (0, R_pad - R), (0, 0))).astype(jnp.bfloat16)

    w_args = [params['w1k'], params['b1f'], params['w2k'], params['b2s'],
              params['w3k'], params['b3s'], params['w4f'], params['b4f']]

    def full_spec(arr):
        nd = arr.ndim
        return pl.BlockSpec(arr.shape, lambda i, nd=nd: (0,) * nd)

    in_specs = ([pl.BlockSpec((49, Rb, C), lambda i: (0, i, 0))]
                + [full_spec(a) for a in w_args])
    out_specs = pl.BlockSpec((Rb, 128), lambda i: (i, 0))
    out_shape = jax.ShapeDtypeStruct((R_pad, 128), jnp.float32)

    out = pl.pallas_call(
        functools.partial(heads_kernel, C=C),
        out_shape=out_shape,
        grid=(R_pad // Rb,),
        in_specs=in_specs,
        out_specs=out_specs,
        scratch_shapes=[pltpu.VMEM((2, 5 * Rb, 9 * C), jnp.bfloat16),
                        pltpu.VMEM((25, Rb, 3 * C), jnp.bfloat16),
                        pltpu.VMEM((3, Rb, 9 * C), jnp.bfloat16)],
        compiler_params=pltpu.CompilerParams(
            dimension_semantics=("parallel",),
            vmem_limit_bytes=48 * 1024 * 1024),
    )(x, *w_args)
    dim = out[:R, 0:3]
    rot_raw = out[:R, 3:11]
    dep_logit = out[:R, 11]
    return dim, rot_raw, dep_logit


# ----------------------------------------------------------------------------
# Plain-JAX glue (ROIAlign, camera unprojection, parameter setup)
# ----------------------------------------------------------------------------
def roi_align(feat, boxes, out_size=7, spatial_scale=0.125):
    # TODO(synk): torchvision ROIAlign uses adaptive sampling_ratio=0; we use a
    # single bilinear sample at each bin centre (aligned=False convention).
    # TODO(synk): for large R this gather + HBM round-trip should be fused into
    # the heads pallas_call via PrefetchScalarGridSpec + pl.ANY feature refs.
    _, Hf, Wf, _ = feat.shape
    batch = boxes[:, 0].astype(jnp.int32)
    x1 = boxes[:, 1] * spatial_scale
    y1 = boxes[:, 2] * spatial_scale
    x2 = boxes[:, 3] * spatial_scale
    y2 = boxes[:, 4] * spatial_scale
    bin_w = jnp.maximum(x2 - x1, 1.0) / out_size
    bin_h = jnp.maximum(y2 - y1, 1.0) / out_size
    centers = jnp.arange(out_size, dtype=jnp.float32) + 0.5
    ys = jnp.clip(y1[:, None] + centers[None, :] * bin_h[:, None], 0.0, Hf - 1.0)
    xs = jnp.clip(x1[:, None] + centers[None, :] * bin_w[:, None], 0.0, Wf - 1.0)
    y0 = jnp.floor(ys)
    x0 = jnp.floor(xs)
    wy = ys - y0
    wx = xs - x0
    y0i = y0.astype(jnp.int32)
    x0i = x0.astype(jnp.int32)
    y1i = jnp.minimum(y0i + 1, Hf - 1)
    x1i = jnp.minimum(x0i + 1, Wf - 1)

    def one(b, y0r, y1r, wyr, x0r, x1r, wxr):
        f = jax.lax.dynamic_index_in_dim(feat, b, axis=0, keepdims=False)
        g = lambda yi, xi: f[yi[:, None], xi[None, :], :]
        wyb = wyr[:, None, None]
        wxb = wxr[None, :, None]
        return (g(y0r, x0r) * (1 - wyb) * (1 - wxb)
                + g(y0r, x1r) * (1 - wyb) * wxb
                + g(y1r, x0r) * wyb * (1 - wxb)
                + g(y1r, x1r) * wyb * wxb)

    return jax.vmap(one)(batch, y0i, y1i, wy, x0i, x1i, wx)   # (R, 7, 7, C) f32


def point3dcoord(cen, dep, calib, position, rotation):
    # tu.point3dcoord_torch: image -> camera -> world
    homo = jnp.concatenate([cen, jnp.ones_like(cen[:, :1])], axis=1) * dep[:, None]
    cam = homo @ jnp.linalg.inv(calib).T
    return cam @ rotation.T + position[None, :]


def init_params(key, C, d):
    keys = iter(jax.random.split(key, 40))
    eps = 1e-5
    bf16 = jnp.bfloat16

    def conv3(k):
        return jax.random.normal(k, (C, C, 3, 3), jnp.float32) * 0.05

    def bn(k):
        k1, k2, k3, k4 = jax.random.split(k, 4)
        gamma = 1.0 + 0.1 * jax.random.normal(k1, (C,), jnp.float32)
        beta = 0.1 * jax.random.normal(k2, (C,), jnp.float32)
        mean = 0.1 * jax.random.normal(k3, (C,), jnp.float32)
        var = 1.0 + 0.1 * jnp.abs(jax.random.normal(k4, (C,), jnp.float32))
        return gamma, beta, mean, var

    def fold(w, bn_p):
        gamma, beta, mean, var = bn_p
        s = gamma / jnp.sqrt(var + eps)
        t = beta - mean * s
        # (co, ci, ki, kj) -> (k = ki*3+kj, ci, co), BN scale folded into co
        w_k = jnp.transpose(w, (2, 3, 1, 0)).reshape(9, C, C) * s[None, None, :]
        return w_k, t.reshape(1, C)

    def head(out_ch):
        ws, bs = [], []
        for _ in range(3):
            wf, bf = fold(conv3(next(keys)), bn(next(keys)))
            ws.append(wf)
            bs.append(bf)
        w4 = jax.random.normal(next(keys), (C, out_ch), jnp.float32) * 0.05
        b4 = 0.1 * jax.random.normal(next(keys), (1, out_ch), jnp.float32)
        return ws, bs, w4, b4

    dws, dbs, w4d, b4d = head(3)   # dim head
    rws, rbs, w4r, b4r = head(8)   # rot head
    pws, pbs, w4p, b4p = head(1)   # dep head

    # layer 1: fuse the 3 heads along output channels; K-stack the 9 taps so
    # the kernel issues ONE (rows, 9C) x (9C, 3C) dot per output row.
    w1k = (jnp.concatenate([dws[0], rws[0], pws[0]], axis=-1)
           .reshape(9 * C, 3 * C).astype(bf16))                        # (9C,3C)
    b1f = jnp.concatenate([dbs[0], rbs[0], pbs[0]], axis=-1)           # (1,3C)
    w2k = jnp.stack([dws[1], rws[1], pws[1]]).reshape(3, 9 * C, C).astype(bf16)
    b2s = jnp.stack([dbs[1], rbs[1], pbs[1]])                          # (3,1,C)
    w3k = jnp.stack([dws[2], rws[2], pws[2]]).reshape(3, 9 * C, C).astype(bf16)
    b3s = jnp.stack([dbs[2], rbs[2], pbs[2]])

    # fused final 1x1 convs as a block matrix -> one lane-dense (Rb,128) output
    w4f = jnp.zeros((3 * C, 128), jnp.float32)
    w4f = w4f.at[0:C, 0:3].set(w4d)
    w4f = w4f.at[C:2 * C, 3:11].set(w4r)
    w4f = w4f.at[2 * C:3 * C, 11:12].set(w4p)
    b4f = jnp.zeros((1, 128), jnp.float32)
    b4f = b4f.at[:, 0:3].set(b4d).at[:, 3:11].set(b4r).at[:, 11:12].set(b4p)

    return {
        'w1k': w1k, 'b1f': b1f,
        'w2k': w2k, 'b2s': b2s,
        'w3k': w3k, 'b3s': b3s,
        'w4f': w4f.astype(bf16), 'b4f': b4f,
        'stem_w': jax.random.normal(next(keys), (3 * d * d, C), jnp.float32) * 0.05,
        'stem_b': 0.1 * jax.random.normal(next(keys), (1, C), jnp.float32),
    }


# ----------------------------------------------------------------------------
# Forward pass (mirrors Model.forward, inference path)
# ----------------------------------------------------------------------------
def forward(image, rois, cen_pd, cam_calib, cam_loc, cam_rot, params, *, d, C):
    # TODO(synk): host-side variable n_gt/n_pd box gathering and the nu.*
    # training losses are data-dependent host logic; here every ROI is valid
    # (score > 0) so num_det = N * n_box.
    N = image.shape[0]
    n_box = rois.shape[1]
    R = N * n_box

    boxes = jnp.concatenate(
        [jnp.repeat(jnp.arange(N, dtype=jnp.float32), n_box)[:, None],
         rois[..., :4].reshape(R, 4)], axis=1)                    # (R, 5)
    cen = cen_pd.reshape(R, 2)

    img_feat = stem(image, params['stem_w'], params['stem_b'], d)  # (N,Hf,Wf,C) bf16
    pooled = roi_align(img_feat, boxes, out_size=7, spatial_scale=1.0 / d)
    dim, rot_raw, dep_logit = run_heads(pooled, params, C)

    # orientation bin normalisation (done outside the head, as in the reference)
    div1 = jnp.sqrt(rot_raw[:, 2:3] ** 2 + rot_raw[:, 3:4] ** 2)
    div2 = jnp.sqrt(rot_raw[:, 6:7] ** 2 + rot_raw[:, 7:8] ** 2)
    rot = jnp.concatenate(
        [rot_raw[:, 0:2], rot_raw[:, 2:3] / div1, rot_raw[:, 3:4] / div1,
         rot_raw[:, 4:6], rot_raw[:, 6:7] / div2, rot_raw[:, 7:8] / div2],
        axis=1)

    # TODO(synk): assumes nu.get_pred_depth(sigmoid(z)) = 1/sigmoid(z) - 1,
    # which equals exp(-z) (numerically stable form).
    dep = jnp.exp(-dep_logit)

    loc = []
    for i in range(N):
        sl = slice(i * n_box, (i + 1) * n_box)
        loc.append(point3dcoord(cen[sl], dep[sl],
                                cam_calib[i], cam_loc[i], cam_rot[i]))
    loc = jnp.concatenate(loc, axis=0)

    return {'rois': rois.reshape(R, 5), 'feat': pooled, 'dim': dim,
            'rot': rot, 'dep': dep, 'cen': cen, 'loc': loc}


# ----------------------------------------------------------------------------
if __name__ == "__main__":
    N, CIN, H, W = 2, 3, 64, 64
    DOWN_RATIO = 8                 # -> num_channel = 128 (DLA channels[3])
    C = 128
    N_BOX = 4

    key = jax.random.PRNGKey(0)
    k_img, k_box, k_param = jax.random.split(key, 3)

    image = jax.random.normal(k_img, (N, CIN, H, W), jnp.float32)

    kx, ky, kw, kh = jax.random.split(k_box, 4)
    x1 = jax.random.uniform(kx, (N, N_BOX), minval=0.0, maxval=W - 24.0)
    y1 = jax.random.uniform(ky, (N, N_BOX), minval=0.0, maxval=H - 24.0)
    bw = jax.random.uniform(kw, (N, N_BOX), minval=8.0, maxval=20.0)
    bh = jax.random.uniform(kh, (N, N_BOX), minval=8.0, maxval=20.0)
    rois = jnp.stack([x1, y1, x1 + bw, y1 + bh, jnp.ones_like(x1)], axis=-1)
    cen_pd = jnp.stack([x1 + bw / 2.0, y1 + bh / 2.0], axis=-1)

    calib = jnp.tile(jnp.array([[50.0, 0.0, W / 2.0],
                                [0.0, 50.0, H / 2.0],
                                [0.0, 0.0, 1.0]], jnp.float32)[None], (N, 1, 1))
    cam_loc = jnp.zeros((N, 3), jnp.float32)
    cam_rot = jnp.tile(jnp.eye(3, dtype=jnp.float32)[None], (N, 1, 1))

    params = init_params(k_param, C, DOWN_RATIO)

    out = forward(image, rois, cen_pd, calib, cam_loc, cam_rot, params,
                  d=DOWN_RATIO, C=C)
    for leaf in jax.tree_util.tree_leaves(out):
        jax.block_until_ready(leaf)

    assert out['dim'].shape == (N * N_BOX, 3)
    assert out['rot'].shape == (N * N_BOX, 8)
    assert out['dep'].shape == (N * N_BOX,)
    assert out['loc'].shape == (N * N_BOX, 3)
    assert out['feat'].shape == (N * N_BOX, 7, 7, C)
    print("KERNEL_OK")
</pallas_src>

<mosaic_0001>
module attributes {stable_mosaic.version = 11 : i64} {
  func.func @stem_kernel(%arg0: i32, %arg1: memref<128x256xbf16, #tpu.memory_space<vmem>>, %arg2: memref<256x128xbf16, #tpu.memory_space<vmem>>, %arg3: memref<1x128xf32, #tpu.memory_space<vmem>>, %arg4: memref<128x128xbf16, #tpu.memory_space<vmem>>) attributes {dimension_semantics = [#tpu.dimension_semantics<parallel>], iteration_bounds = array<i64: 1>, scalar_prefetch = 0 : i64, scratch_operands = 0 : i64, tpu.core_type = #tpu.core_type<tc>, window_params = [{transform_indices = @transform_0, window_bounds = array<i64: 128, 256>}, {pipeline_mode = #tpu.pipeline_mode<synchronous>, transform_indices = @transform_1, window_bounds = array<i64: 256, 128>}, {pipeline_mode = #tpu.pipeline_mode<synchronous>, transform_indices = @transform_2, window_bounds = array<i64: 1, 128>}, {transform_indices = @transform_3, window_bounds = array<i64: 128, 128>}]} {
    %c0 = arith.constant 0 : index
    %c0_0 = arith.constant 0 : index
    %0 = vector.load %arg1[%c0, %c0_0] : memref<128x256xbf16, #tpu.memory_space<vmem>>, vector<128x256xbf16>
    %c0_1 = arith.constant 0 : index
    %c0_2 = arith.constant 0 : index
    %1 = vector.load %arg2[%c0_1, %c0_2] : memref<256x128xbf16, #tpu.memory_space<vmem>>, vector<256x128xbf16>
    %cst = arith.constant dense<0.000000e+00> : vector<128x128xf32>
    %2 = tpu.matmul %0, %1, %cst {dimension_numbers = #tpu.dot_dimension_numbers<[1], [0], [0], [1], [0, 0, 1, 1], [], []>} : vector<128x256xbf16>, vector<256x128xbf16>, vector<128x128xf32> -> vector<128x128xf32>
    %c0_3 = arith.constant 0 : index
    %c0_4 = arith.constant 0 : index
    %3 = vector.load %arg3[%c0_3, %c0_4] : memref<1x128xf32, #tpu.memory_space<vmem>>, vector<1x128xf32>
    %4 = vector.broadcast %3 : vector<1x128xf32> to vector<128x128xf32>
    %5 = arith.addf %2, %4 : vector<128x128xf32>
    %cst_5 = arith.constant 0.000000e+00 : f32
    %6 = vector.broadcast %cst_5 : f32 to vector<128x128xf32>
    %7 = arith.maximumf %5, %6 : vector<128x128xf32>
    %8 = arith.truncf %7 : vector<128x128xf32> to vector<128x128xbf16>
    %c0_6 = arith.constant 0 : index
    %c0_7 = arith.constant 0 : index
    %9 = vector.load %arg4[%c0_6, %c0_7] : memref<128x128xbf16, #tpu.memory_space<vmem>>, vector<128x128xbf16>
    tpu.vector_store %arg4[%c0_6, %c0_7], %8 {strides = array<i32>} : memref<128x128xbf16, #tpu.memory_space<vmem>>, vector<128x128xbf16>,
    return
  }
  func.func @transform_0(%arg0: i32) -> (i32, i32) {
    %c0_i32 = arith.constant 0 : i32
    %c0_i32_0 = arith.constant 0 : i32
    return %arg0, %c0_i32 : i32, i32
  }
  func.func @transform_1(%arg0: i32) -> (i32, i32) {
    %c0_i32 = arith.constant 0 : i32
    %c0_i32_0 = arith.constant 0 : i32
    %c0_i32_1 = arith.constant 0 : i32
    return %c0_i32, %c0_i32_0 : i32, i32
  }
  func.func @transform_2(%arg0: i32) -> (i32, i32) {
    %c0_i32 = arith.constant 0 : i32
    %c0_i32_0 = arith.constant 0 : i32
    %c0_i32_1 = arith.constant 0 : i32
    return %c0_i32, %c0_i32_0 : i32, i32
  }
  func.func @transform_3(%arg0: i32) -> (i32, i32) {
    %c0_i32 = arith.constant 0 : i32
    %c0_i32_0 = arith.constant 0 : i32
    return %arg0, %c0_i32 : i32, i32
  }
}

</mosaic_0001>

<bundles_post_ra>
// kernel: tpu_custom_call.1
= control target key start
LH: loop header
LB: loop body
LE: loop exit
PB: predicated region body
PF: predicated region fallthrough
CT: control target
= control target key end

     0   :  { %8 = vsyncpa [#allocation3], 0  ;;  %s887_s0 = inlined_call_operand.hbm [shape: bf16[128,256], index: 0, kind: input, shape index: {}]   ;;  %s888_s1 = inlined_call_operand.hbm [shape: bf16[256,128], index: 1, kind: input, shape index: {}]   ;;  %s889_s2 = inlined_call_operand.vmem [shape: f32[1,128], index: 2, kind: input, shape index: {}]   ;;  %s890_s3 = inlined_call_operand.hbm [shape: bf16[128,128], index: 3, kind: output, shape index: {}]  }
   0x1   :  { %9 = vsyncpa [#allocation6], 0 }
   0x2   :  { %10 = vsyncpa [#allocation4], 0  ;;  %s797_s12 = smov [#allocation2]   ;;  %s725_s16 = scalar_lea.hbm %s887_s0, 2048 }
   0x3   :  { %s16_s13 = sshll.u32 %s797_s12, 4  ;;  %p726_p0 = scmp.ne.s32.totalorder %s887_s0, %s725_s16  ;;  %s17_s13 = int_to_ptr.vmem [resolvable:$true] %s16_s13 }
   0x4   :  { %p729_p1 = scmp.lt.u32.totalorder %s725_s16, %s887_s0 }
   0x6   :  { %p731_p2 = pnand %p729_p1, %p726_p0 }
   0x8   :  { %734 = shalt.err (!%p731_p2)
}
   0x9   :  { %s735_s21 = scalar_lea.vmem %s17_s13, 2048  ;;  %p740_p4 = scmp.lt.s32.totalorder %s17_s13, %s17_s13 }
   0xa   :  { %p736_p3 = scmp.ne.s32.totalorder %s17_s13, %s735_s21  ;;  %p741_p5 = scmp.lt.s32.totalorder %s735_s21, %s735_s21 }
   0xc   :  { %p742_p6 = por %p741_p5, %p740_p4 }
   0xe   :  { %p743_p7 = pnand %p742_p6, %p736_p3 }
  0x10   :  { %746 = shalt.err (!%p743_p7)
}
  0x11   :  { %s798_s22 = smov 128   ;;  %s799_s23 = smov 8  }
  0x12   :  { %22 = dma.hbm_to_vmem [thread:$0]  %s887_s0, 2048, %s17_s13, [#allocation3], %s798_s22, %s798_s22, %s799_s23  }
  0x13   :  { %s800_s26 = smov [#allocation5]   ;;  %s747_s30 = scalar_lea.hbm %s888_s1, 2048 }
  0x14   :  { %s28_s27 = sshll.u32 %s800_s26, 4  ;;  %p748_p8 = scmp.ne.s32.totalorder %s888_s1, %s747_s30  ;;  %s29_s27 = int_to_ptr.vmem [resolvable:$true] %s28_s27 }
  0x15   :  { %p751_p9 = scmp.lt.u32.totalorder %s747_s30, %s888_s1 }
  0x17   :  { %p753_p10 = pnand %p751_p9, %p748_p8 }
  0x19   :  { %756 = shalt.err (!%p753_p10)
}
  0x1a   :  { %s757_s8 = scalar_lea.vmem %s29_s27, 2048  ;;  %p762_p12 = scmp.lt.s32.totalorder %s29_s27, %s29_s27 }
  0x1b   :  { %p758_p11 = scmp.ne.s32.totalorder %s29_s27, %s757_s8  ;;  %p763_p13 = scmp.lt.s32.totalorder %s757_s8, %s757_s8 }
  0x1d   :  { %p764_p0 = por %p763_p13, %p762_p12 }
  0x1f   :  { %p765_p1 = pnand %p764_p0, %p758_p11 }
  0x21   :  { %768 = shalt.err (!%p765_p1)
}
  0x22   :  { %s801_s0 = smov 64   ;;  %s802_s9 = smov 4  }
  0x23   :  { %34 = dma.hbm_to_vmem [thread:$0]  %s888_s1, 2048, %s29_s27, [#allocation6], %s801_s0, %s801_s0, %s802_s9  }
  0x24   :  { %791 = dma.done.wait [#allocation3], 2048  }
  0x25   :  { %792 = vsyncadd [#allocation3], 4294965248 }
  0x26   :  { %793 = dma.done.wait [#allocation6], 2048  }
  0x27   :  { %794 = vsyncadd [#allocation6], 4294965248  ;;  %v685_v0 = vld [vmem:[#allocation5 + $0x40] sm:$0xff]   ;;  %v687_v2 = vld [vmem:[#allocation5 + $0x48] sm:$0xff]  }
  0x28   :  { %v686_v1 = vld [vmem:[#allocation5] sm:$0xff]   ;;  %598 = vmatprep.subr.bf16.mxu0 %v685_v0  ;;  %662 = vmatprep.subr.bf16.mxu1 %v685_v0  ;;  %v688_v3 = vld [vmem:[#allocation5 + $0x8] sm:$0xff]   ;;  %v689_v4 = vld [vmem:[#allocation5 + $0x50] sm:$0xff]  }
  0x29   :  { %599 = vmatpush3.bf16.msra.mxu0 %v686_v1  ;;  %670 = vmatpush3.bf16.msra.mxu1 %v686_v1  ;;  %v690_v5 = vld [vmem:[#allocation5 + $0x10] sm:$0xff]   ;;  %v691_v6 = vld [vmem:[#allocation5 + $0x58] sm:$0xff]   ;;  %v693_v8 = vld [vmem:[#allocation5 + $0x60] sm:$0xff]  }
  0x2a   :  { %600 = vmatprep.subr.bf16.mxu0 %v687_v2  ;;  %663 = vmatprep.subr.bf16.mxu1 %v687_v2  ;;  %v692_v7 = vld [vmem:[#allocation5 + $0x18] sm:$0xff]   ;;  %v694_v9 = vld [vmem:[#allocation5 + $0x20] sm:$0xff]   ;;  %v695_v10 = vld [vmem:[#allocation5 + $0x68] sm:$0xff]  }
  0x2b   :  { %v703_v11 = vld [vmem:[#allocation2 + $0x4] ss:$8 sps:$4 sm:$0xff]   ;;  %v697_v14 = vld [vmem:[#allocation5 + $0x70] sm:$0xff]   ;;  %v699_v16 = vld [vmem:[#allocation5 + $0x78] sm:$0xff]  }
  0x2c   :  { %v706_v12 = vld [vmem:[#allocation2 + $0x44] ss:$8 sps:$4 sm:$0xff]   ;;  %307 = vmatprep.mubr.bf16.mxu0 %v703_v11  ;;  %v698_v15 = vld [vmem:[#allocation5 + $0x30] sm:$0xff]   ;;  %v700_v17 = vld [vmem:[#allocation5 + $0x38] sm:$0xff]  }
  0x2d   :  { %601 = vmatpush3.bf16.msra.mxu0 %v688_v3  ;;  %671 = vmatpush3.bf16.msra.mxu1 %v688_v3  ;;  %v696_v13 = vld [vmem:[#allocation5 + $0x28] sm:$0xff]   ;;  %v707_v20 = vld [vmem:[#allocation2 + $0x14] ss:$8 sps:$4 sm:$0xff]   ;;  %v711_v22 = vld [vmem:[#allocation2 + $0x10] ss:$8 sps:$4 sm:$0xff]  }
  0x2e   :  { %602 = vmatprep.subr.bf16.mxu0 %v689_v4  ;;  %664 = vmatprep.subr.bf16.mxu1 %v689_v4  ;;  %v701_v18 = vld [vmem:[#allocation2] ss:$8 sps:$4 sm:$0xff]   ;;  %v709_v21 = vld [vmem:[#allocation2 + $0x54] ss:$8 sps:$4 sm:$0xff]   ;;  %v712_v23 = vld [vmem:[#allocation2 + $0x50] ss:$8 sps:$4 sm:$0xff]  }
  0x2f   :  { %339 = vmatprep.mubr.bf16.mxu1 %v706_v12  ;;  %v704_v19 = vld [vmem:[#allocation2 + $0x40] ss:$8 sps:$4 sm:$0xff]   ;;  %v713_v24 = vld [vmem:[#allocation2 + $0x24] ss:$8 sps:$4 sm:$0xff]   ;;  %v719_v28 = vld [vmem:[#allocation2 + $0x34] ss:$8 sps:$4 sm:$0xff]  }
  0x30   :  { %v715_v25 = vld [vmem:[#allocation2 + $0x64] ss:$8 sps:$4 sm:$0xff]   ;;  %v717_v26 = vld [vmem:[#allocation2 + $0x20] ss:$8 sps:$4 sm:$0xff]   ;;  %v721_v29 = vld [vmem:[#allocation2 + $0x74] ss:$8 sps:$4 sm:$0xff]  }
  0x31   :  { %603 = vmatpush3.bf16.msra.mxu0 %v690_v5  ;;  %672 = vmatpush3.bf16.msra.mxu1 %v690_v5  ;;  %v718_v27 = vld [vmem:[#allocation2 + $0x60] ss:$8 sps:$4 sm:$0xff]   ;;  %v723_v30 = vld [vmem:[#allocation2 + $0x30] ss:$8 sps:$4 sm:$0xff]  }
  0x32   :  { %604 = vmatprep.subr.bf16.mxu0 %v691_v6  ;;  %665 = vmatprep.subr.bf16.mxu1 %v691_v6  ;;  %v724_v31 = vld [vmem:[#allocation2 + $0x70] ss:$8 sps:$4 sm:$0xff]   ;;  %v854_v34 = vld [vmem:[%s889_s2] ss:$0 sm:$0xff]  ;;  %s803_s2 = smov [#allocation7]  }
  0x33   :  { %s473_s13 = sshll.u32 %s803_s2, 4  ;;  %s474_s13 = int_to_ptr.vmem [resolvable:$true] %s473_s13 }
  0x34   :  { %s769_s14 = scalar_lea.vmem %s474_s13, 1024  ;;  %p774_p3 = scmp.lt.s32.totalorder %s474_s13, %s474_s13 }
  0x35   :  { %605 = vmatpush3.bf16.msra.mxu0 %v692_v7  ;;  %673 = vmatpush3.bf16.msra.mxu1 %v692_v7  ;;  %p770_p2 = scmp.ne.s32.totalorder %s474_s13, %s769_s14  ;;  %p775_p4 = scmp.lt.s32.totalorder %s769_s14, %s769_s14 }
  0x36   :  { %606 = vmatprep.subr.bf16.mxu0 %v693_v8  ;;  %666 = vmatprep.subr.bf16.mxu1 %v693_v8 }
  0x37   :  { %p776_p5 = por %p775_p4, %p774_p3 }
  0x39   :  { %607 = vmatpush3.bf16.msra.mxu0 %v694_v9  ;;  %674 = vmatpush3.bf16.msra.mxu1 %v694_v9  ;;  %p777_p6 = pnand %p776_p5, %p770_p2 }
  0x3a   :  { %608 = vmatprep.subr.bf16.mxu0 %v695_v10  ;;  %667 = vmatprep.subr.bf16.mxu1 %v695_v10 }
  0x3d   :  { %609 = vmatpush3.bf16.msra.mxu0 %v696_v13  ;;  %675 = vmatpush3.bf16.msra.mxu1 %v696_v13 }
  0x3e   :  { %610 = vmatprep.subr.bf16.mxu0 %v697_v14  ;;  %668 = vmatprep.subr.bf16.mxu1 %v697_v14 }
  0x41   :  { %611 = vmatpush3.bf16.msra.mxu0 %v698_v15  ;;  %676 = vmatpush3.bf16.msra.mxu1 %v698_v15 }
  0x42   :  { %612 = vmatprep.subr.bf16.mxu0 %v699_v16  ;;  %669 = vmatprep.subr.bf16.mxu1 %v699_v16 }
  0x45   :  { %613 = vmatpush3.bf16.msra.mxu0 %v700_v17  ;;  %677 = vmatpush3.bf16.msra.mxu1 %v700_v17 }
  0x48   :  { %308 = vmatmul.mubr.bf16.vlgmr.msra.gmra.mrb[0].mxu0 %v701_v18  ;;  %340 = vmatmul.mubr.bf16.vlgmr.msra.gmra.mrb[0].mxu1 %v704_v19 }
  0x49   :  { %315 = vmatprep.mubr.bf16.mxu0 %v707_v20  ;;  %347 = vmatprep.mubr.bf16.mxu1 %v709_v21 }
  0x50   :  { %316 = vmatmul.mubr.bf16.gmra.mrb[4].mxu0 %v711_v22  ;;  %348 = vmatmul.mubr.bf16.gmra.mrb[4].mxu1 %v712_v23 }
  0x51   :  { %323 = vmatprep.mubr.bf16.mxu0 %v713_v24  ;;  %355 = vmatprep.mubr.bf16.mxu1 %v715_v25 }
  0x58   :  { %324 = vmatmul.mubr.bf16.gmra.mrb[8].mxu0 %v717_v26  ;;  %356 = vmatmul.mubr.bf16.gmra.mrb[8].mxu1 %v718_v27 }
  0x59   :  { %331 = vmatprep.mubr.bf16.mxu0 %v719_v28  ;;  %363 = vmatprep.mubr.bf16.mxu1 %v721_v29 }
  0x60   :  { %332 = vmatmul.mubr.bf16.gmra.mrb[12].mxu0 %v723_v30  ;;  %364 = vmatmul.mubr.bf16.gmra.mrb[12].mxu1 %v724_v31 }
 0x11b   :  { %v614_v32 = vpop.f32.mrb[0].mxu0  ;;  %v638_v33 = vpop.f32.mrb[0].mxu1 }
 0x11c   :  { %v615_v35 = vpop.f32.mrb[1].mxu0  ;;  %v639_v36 = vpop.f32.mrb[1].mxu1 }
 0x11d   :  { %v616_v37 = vadd.f32 %v615_v35, %v614_v32  ;;  %v640_v38 = vadd.f32 %v639_v36, %v638_v33  ;;  %v617_v39 = vpop.f32.mrb[2].mxu0  ;;  %v641_v40 = vpop.f32.mrb[2].mxu1 }
 0x11e   :  { %v618_v41 = vpop.f32.mrb[3].mxu0  ;;  %v642_v42 = vpop.f32.mrb[3].mxu1 }
 0x11f   :  { %v310_v43 = vadd.f32 %v616_v37, %v854_v34  ;;  %v342_v44 = vadd.f32 %v640_v38, %v854_v34  ;;  %v619_v45 = vadd.f32 %v618_v41, %v617_v39  ;;  %v643_v46 = vadd.f32 %v642_v42, %v641_v40 }
 0x121   :  { %v313_v47 = vadd.f32 %v619_v45, %v854_v34  ;;  %v345_v48 = vadd.f32 %v643_v46, %v854_v34  ;;  %v372_v49 = vmax.f32 %v310_v43, 0.0  ;;  %v380_v50 = vmax.f32 %v342_v44, 0.0 }
 0x123   :  { %v373_v51 = vmax.f32 %v313_v47, 0.0  ;;  %v381_v52 = vmax.f32 %v345_v48, 0.0  ;;  %v620_v53 = vpop.f32.mrb[4].mxu0  ;;  %v644_v54 = vpop.f32.mrb[4].mxu1 }
 0x124   :  { %v621_v55 = vpop.f32.mrb[5].mxu0  ;;  %v645_v56 = vpop.f32.mrb[5].mxu1 }
 0x125   :  { %v554_v57 = vpack.c.bf16 %v373_v51, %v372_v49  ;;  %v574_v58 = vpack.c.bf16 %v381_v52, %v380_v50  ;;  %v622_v59 = vadd.f32 %v621_v55, %v620_v53  ;;  %v646_v60 = vadd.f32 %v645_v56, %v644_v54  ;;  %v623_v61 = vpop.f32.mrb[6].mxu0  ;;  %v647_v62 = vpop.f32.mrb[6].mxu1 }
 0x126   :  { %v624_v63 = vpop.f32.mrb[7].mxu0  ;;  %v648_v0 = vpop.f32.mrb[7].mxu1 }
 0x127   :  { %555 = vst [vmem:[#allocation7] sm:$0xff] %v554_v57   ;;  %594 = vst [vmem:[#allocation7 + $0x20] sm:$0xff] %v574_v58   ;;  %v318_v1 = vadd.f32 %v622_v59, %v854_v34  ;;  %v350_v2 = vadd.f32 %v646_v60, %v854_v34  ;;  %v625_v3 = vadd.f32 %v624_v63, %v623_v61 }
 0x128   :  { %v649_v4 = vadd.f32 %v648_v0, %v647_v62 }
 0x129   :  { %v321_v5 = vadd.f32 %v625_v3, %v854_v34  ;;  %v374_v7 = vmax.f32 %v318_v1, 0.0  ;;  %v382_v8 = vmax.f32 %v350_v2, 0.0 }
 0x12a   :  { %v353_v6 = vadd.f32 %v649_v4, %v854_v34 }
 0x12b   :  { %v375_v9 = vmax.f32 %v321_v5, 0.0  ;;  %v626_v11 = vpop.f32.mrb[8].mxu0  ;;  %v650_v12 = vpop.f32.mrb[8].mxu1 }
 0x12c   :  { %v383_v10 = vmax.f32 %v353_v6, 0.0  ;;  %v627_v13 = vpop.f32.mrb[9].mxu0  ;;  %v651_v14 = vpop.f32.mrb[9].mxu1 }
 0x12d   :  { %v559_v15 = vpack.c.bf16 %v375_v9, %v374_v7  ;;  %v628_v17 = vadd.f32 %v627_v13, %v626_v11  ;;  %v652_v18 = vadd.f32 %v651_v14, %v650_v12  ;;  %v629_v19 = vpop.f32.mrb[10].mxu0  ;;  %v653_v20 = vpop.f32.mrb[10].mxu1 }
 0x12e   :  { %v579_v16 = vpack.c.bf16 %v383_v10, %v382_v8  ;;  %v630_v21 = vpop.f32.mrb[11].mxu0  ;;  %v654_v22 = vpop.f32.mrb[11].mxu1 }
 0x12f   :  { %591 = vst [vmem:[#allocation7 + $0x8] sm:$0xff] %v559_v15   ;;  %v326_v23 = vadd.f32 %v628_v17, %v854_v34  ;;  %v358_v24 = vadd.f32 %v652_v18, %v854_v34  ;;  %v631_v25 = vadd.f32 %v630_v21, %v629_v19  ;;  %v655_v26 = vadd.f32 %v654_v22, %v653_v20 }
 0x130   :  { %595 = vst [vmem:[#allocation7 + $0x28] sm:$0xff] %v579_v16  }
 0x131   :  { %v329_v27 = vadd.f32 %v631_v25, %v854_v34  ;;  %v361_v28 = vadd.f32 %v655_v26, %v854_v34  ;;  %v376_v29 = vmax.f32 %v326_v23, 0.0  ;;  %v384_v30 = vmax.f32 %v358_v24, 0.0 }
 0x133   :  { %v377_v31 = vmax.f32 %v329_v27, 0.0  ;;  %v385_v32 = vmax.f32 %v361_v28, 0.0  ;;  %v632_v33 = vpop.f32.mrb[12].mxu0  ;;  %v656_v35 = vpop.f32.mrb[12].mxu1 }
 0x134   :  { %v633_v36 = vpop.f32.mrb[13].mxu0  ;;  %v657_v37 = vpop.f32.mrb[13].mxu1 }
 0x135   :  { %v564_v38 = vpack.c.bf16 %v377_v31, %v376_v29  ;;  %v584_v39 = vpack.c.bf16 %v385_v32, %v384_v30  ;;  %v634_v40 = vadd.f32 %v633_v36, %v632_v33  ;;  %v658_v41 = vadd.f32 %v657_v37, %v656_v35  ;;  %v635_v42 = vpop.f32.mrb[14].mxu0  ;;  %v659_v43 = vpop.f32.mrb[14].mxu1 }
 0x136   :  { %v636_v44 = vpop.f32.mrb[15].mxu0  ;;  %v660_v45 = vpop.f32.mrb[15].mxu1 }
 0x137   :  { %592 = vst [vmem:[#allocation7 + $0x10] sm:$0xff] %v564_v38   ;;  %596 = vst [vmem:[#allocation7 + $0x30] sm:$0xff] %v584_v39   ;;  %v334_v46 = vadd.f32 %v634_v40, %v854_v34  ;;  %v366_v47 = vadd.f32 %v658_v41, %v854_v34  ;;  %v637_v48 = vadd.f32 %v636_v44, %v635_v42 }
 0x138   :  { %v661_v49 = vadd.f32 %v660_v45, %v659_v43 }
 0x139   :  { %v337_v50 = vadd.f32 %v637_v48, %v854_v34  ;;  %v378_v52 = vmax.f32 %v334_v46, 0.0  ;;  %v386_v53 = vmax.f32 %v366_v47, 0.0 }
 0x13a   :  { %v369_v51 = vadd.f32 %v661_v49, %v854_v34 }
 0x13b   :  { %v379_v54 = vmax.f32 %v337_v50, 0.0 }
 0x13c   :  { %v387_v55 = vmax.f32 %v369_v51, 0.0 }
 0x13d   :  { %v569_v56 = vpack.c.bf16 %v379_v54, %v378_v52 }
 0x13e   :  { %v589_v57 = vpack.c.bf16 %v387_v55, %v386_v53 }
 0x13f   :  { %593 = vst [vmem:[#allocation7 + $0x18] sm:$0xff] %v569_v56  }
 0x140   :  { %597 = vst [vmem:[#allocation7 + $0x38] sm:$0xff] %v589_v57  }
 0x141   :  { %780 = shalt.err (!%p777_p6)
}
 0x142   :  { %s781_s17 = scalar_lea.hbm %s890_s3, 1024 }
 0x143   :  { %p782_p7 = scmp.ne.s32.totalorder %s890_s3, %s781_s17  ;;  %p785_p8 = scmp.lt.u32.totalorder %s781_s17, %s890_s3 }
 0x145   :  { %p787_p9 = pnand %p785_p8, %p782_p7 }
 0x147   :  { %790 = shalt.err (!%p787_p9)
}
 0x148   :  { %479 = dma.vmem_to_hbm [thread:$0]  %s474_s13, 1024, %s890_s3, [#allocation4], %s801_s0, %s801_s0, %s802_s9  }
 0x149   :  { %795 = dma.done.wait [#allocation4], 1024  }
 0x14a   :  { %796 = vsyncadd [#allocation4], 4294966272 }
 0x14b   :  { %483 = vsyncpa [#allocation3], 1 }
 0x14c   :  { %484 = vsyncpa [#allocation6], 1 }
 0x14d   :  { %485 = vsyncpa [#allocation4], 1 }

</bundles_post_ra>
